<compile_context>
chip_gen: v6e
topology: v6e:2x2x1
jax: 0.10.0
libtpu: 0.0.40
codegen_flags: <defaults>
</compile_context>

<pallas_src>
import jax
import jax.numpy as jnp
from jax.experimental import pallas as pl
from jax.experimental.pallas import tpu as pltpu

GAMMA = 2  # module default


def _cdiv(a, b):
    return -(-a // b)


def _round_up(a, b):
    return _cdiv(a, b) * b


def _device_kind():
    try:
        return jax.devices()[0].device_kind.lower()
    except Exception:
        return ""


def focal_loss_ref(logits, target):
    """Pure-JAX reference of the PyTorch module (also used for tiny-shape bypass)."""
    logpt = jax.nn.log_softmax(logits.astype(jnp.float32), axis=1)
    pt = jnp.exp(logpt)
    mod = (1.0 - pt) ** GAMMA * logpt
    picked = jnp.take_along_axis(mod, target[:, None].astype(jnp.int32), axis=1)[:, 0]
    return -jnp.mean(picked)


def _make_kernel(bf16_native):
    def _focal_loss_kernel(nvalid_ref, x_ref, t_ref, o_ref, acc_ref):
        # nvalid_ref: SMEM (1,) i32  -- true N (scalar prefetch)
        # x_ref:      [TN, C] logits tile (input dtype)
        # t_ref:      [TN, 1] i32 targets tile
        # o_ref:      (1, 1, 1) f32 per-core partial sum
        # acc_ref:    (1, 1) f32 VMEM scratch accumulator
        i = pl.program_id(0)                 # core-split axis ("parallel")
        j = pl.program_id(1)                 # row-tile axis ("arbitrary", reduction)
        tiles_per_core = pl.num_programs(1)

        @pl.when(j == 0)
        def _():
            acc_ref[...] = jnp.zeros_like(acc_ref)

        x_in = x_ref[...]                    # [TN, C] input dtype
        t = t_ref[...]                       # [TN, 1] i32
        tn, c = x_in.shape

        # (1, C) iota only; the == comparison broadcasts against (TN, 1) targets.
        class_ids = jax.lax.broadcasted_iota(jnp.int32, (1, c), 1)
        onehot = class_ids == t              # [TN, C] bool

        if bf16_native and x_in.dtype == jnp.bfloat16:
            # max and the one-hot pick are exact in bf16 -> packed (half-cost) VPU ops
            # on v6e/v7x.  Only (x - m), exp, log run in f32.
            m = jnp.max(x_in, axis=1, keepdims=True).astype(jnp.float32)      # [TN,1]
            x_t = jnp.sum(jnp.where(onehot, x_in, 0),
                          axis=1, keepdims=True).astype(jnp.float32)          # [TN,1]
            xm = x_in.astype(jnp.float32) - m                                 # [TN,C]
            xm_t = x_t - m                                                    # [TN,1]
        else:
            x = x_in.astype(jnp.float32)                                      # [TN,C]
            m = jnp.max(x, axis=1, keepdims=True)                             # [TN,1]
            xm = x - m                                                        # [TN,C]
            # Pick on xm directly -> one fewer full-tile temporary and no extra
            # [TN,1] subtract.
            xm_t = jnp.sum(jnp.where(onehot, xm, 0.0), axis=1, keepdims=True)  # [TN,1]

        # Numerically stable logsumexp along the class axis (single exp pass).
        sumexp = jnp.sum(jnp.exp(xm), axis=1, keepdims=True)                  # [TN,1]

        # Focal modulation applied to the picked column only (gamma == 2).
        logpt_t = xm_t - jnp.log(sumexp)                                      # [TN,1]
        pt_t = jnp.exp(logpt_t)
        one_minus = 1.0 - pt_t
        picked = one_minus * one_minus * logpt_t                              # [TN,1]

        # Mask rows beyond the true N (ragged tail / duplicated clamped blocks).
        n_true = nvalid_ref[0]
        block_idx = i * tiles_per_core + j
        row_ids = block_idx * tn + jax.lax.broadcasted_iota(jnp.int32, (tn, 1), 0)
        contrib = jnp.where(row_ids < n_true, picked, 0.0)

        acc_ref[...] += jnp.sum(contrib, axis=0, keepdims=True)               # (1, 1)

        # NOTE: write-once-per-core is legal only because the output block index is
        # constant along the j axis.  Do not reorder the grid or mark j "parallel".
        @pl.when(j == tiles_per_core - 1)
        def _():
            o_ref[0] = acc_ref[...]

    return _focal_loss_kernel


def focal_loss(logits, target, *, tile_n=None, force_pallas=False):
    """logits: [N, C] float32 or bfloat16, target: [N] int. Returns scalar f32 loss."""
    n, c = logits.shape
    itemsize = jnp.dtype(logits.dtype).itemsize

    # Tiny problems: kernel launch + grid overhead dwarfs the work; use XLA's fused path.
    if not force_pallas and n * c * itemsize < 256 * 1024:
        return focal_loss_ref(logits, target)

    kind = _device_kind()
    is_v7x = "v7" in kind
    is_v5e = ("v5 lite" in kind) or ("v5e" in kind) or ("v5lite" in kind)

    sub = max(8, 32 // itemsize)  # sublane multiple: 8 for f32, 16 for bf16

    if tile_n is None:
        # Per-generation byte budget for ONE row-tile's total VMEM footprint:
        #   v7x : 64 MiB physical VMEM per TC  -> ~3 MiB budget
        #   v5e / v6e : 128 MiB physical       -> ~8 MiB budget
        tile_budget = (3 * 2**20) if is_v7x else (8 * 2**20)
        c_lanes = _round_up(c, 128)  # lane-padded width in VMEM
        bytes_per_row = (
            2 * c_lanes * itemsize   # double-buffered logits input tile
            + 2 * 128 * 4            # double-buffered (TN,1) i32 targets, 128-lane padded
            + 4 * c_lanes * 4        # in-kernel f32 full-tile temporaries (xm, exp, mask/select)
        )
        tile_n = max(sub, tile_budget // bytes_per_row)
    tile_n = max(sub, (tile_n // sub) * sub)
    if n <= tile_n:
        tile_n = n  # a single block equal to the full dim is always legal

    n_tiles = _cdiv(n, tile_n)
    # 2 TensorCores per chip only on v7x; single-TC chips get n_cores=1 (no wasted
    # duplicate block, no serialized fake-parallel axis).
    n_cores = 2 if (is_v7x and n_tiles >= 2) else 1
    tiles_per_core = _cdiv(n_tiles, n_cores)

    def row_block(i, j, nref):
        # Clamp so a fully-out-of-range block (odd n_tiles on v7x) stays in bounds;
        # its rows are masked out inside the kernel via the true-N row mask.
        return (jnp.minimum(i * tiles_per_core + j, n_tiles - 1), 0)

    t2d = target.astype(jnp.int32).reshape(n, 1)
    nvalid = jnp.array([n], dtype=jnp.int32)

    vmem_limit = (48 if is_v7x else 64) * 1024 * 1024

    partials = pl.pallas_call(
        _make_kernel(bf16_native=not is_v5e),
        out_shape=jax.ShapeDtypeStruct((n_cores, 1, 1), jnp.float32),
        grid_spec=pltpu.PrefetchScalarGridSpec(
            num_scalar_prefetch=1,
            grid=(n_cores, tiles_per_core),
            in_specs=[
                pl.BlockSpec((tile_n, c), row_block),
                pl.BlockSpec((tile_n, 1), row_block),
            ],
            out_specs=pl.BlockSpec((1, 1, 1), lambda i, j, nref: (i, 0, 0)),
            scratch_shapes=[pltpu.VMEM((1, 1), jnp.float32)],
        ),
        compiler_params=pltpu.CompilerParams(
            dimension_semantics=("parallel", "arbitrary"),
            vmem_limit_bytes=vmem_limit,
        ),
    )(nvalid, logits, t2d)

    return -jnp.sum(partials) / float(n)


if __name__ == "__main__":
    key = jax.random.PRNGKey(0)
    k1, k2, k3, k4 = jax.random.split(key, 4)

    # (a) module-spec tiny shape (N=8, C=16, f32): takes the pure-JAX bypass path.
    N, C = 8, 16
    logits = jax.random.normal(k1, (N, C), dtype=jnp.float32)
    target = jax.random.randint(k2, (N,), 0, C, dtype=jnp.int32)
    loss = focal_loss(logits, target)
    jax.block_until_ready(loss)
    ref = focal_loss_ref(logits, target)
    assert jnp.allclose(loss, ref, atol=1e-5, rtol=1e-5), (loss, ref)

    # (b) Pallas path, f32: N-tiling, ragged tail masking, multi-tile reduction
    #     (forced small tile to exercise the grid and the true-N mask).
    N2, C2 = 300, 16
    logits2 = jax.random.normal(k3, (N2, C2), dtype=jnp.float32)
    target2 = jax.random.randint(k4, (N2,), 0, C2, dtype=jnp.int32)
    loss2 = focal_loss(logits2, target2, tile_n=64, force_pallas=True)
    jax.block_until_ready(loss2)
    ref2 = focal_loss_ref(logits2, target2)
    assert jnp.allclose(loss2, ref2, atol=1e-5, rtol=1e-5), (loss2, ref2)

    # (c) Pallas path, auto tile sizing (single block here) with f32.
    loss2b = focal_loss(logits2, target2, force_pallas=True)
    jax.block_until_ready(loss2b)
    assert jnp.allclose(loss2b, ref2, atol=1e-5, rtol=1e-5), (loss2b, ref2)

    # (d) bf16 logits stay bf16 on the HBM side; max/pick in bf16, exp/log in f32.
    logits_bf16 = logits2.astype(jnp.bfloat16)
    loss3 = focal_loss(logits_bf16, target2, tile_n=128, force_pallas=True)
    jax.block_until_ready(loss3)
    ref3 = focal_loss_ref(logits_bf16, target2)
    assert jnp.allclose(loss3, ref3, atol=1e-4, rtol=1e-4), (loss3, ref3)

    print("KERNEL_OK")
</pallas_src>

<mosaic_0001>
module attributes {stable_mosaic.version = 11 : i64} {
  func.func @_focal_loss_kernel(%arg0: i32, %arg1: i32, %arg2: memref<1xi32, #tpu.memory_space<smem>>, %arg3: memref<64x16xf32, #tpu.memory_space<vmem>>, %arg4: memref<64x1xi32, #tpu.memory_space<vmem>>, %arg5: memref<1x1x1xf32, #tpu.memory_space<vmem>>, %arg6: memref<1x1xf32, #tpu.memory_space<vmem>>) attributes {dimension_semantics = [#tpu.dimension_semantics<parallel>, #tpu.dimension_semantics<arbitrary>], iteration_bounds = array<i64: 1, 5>, scalar_prefetch = 1 : i64, scratch_operands = 1 : i64, tpu.core_type = #tpu.core_type<tc>, window_params = [{transform_indices = @transform_0, window_bounds = array<i64: 64, 16>}, {transform_indices = @transform_1, window_bounds = array<i64: 64, 1>}, {transform_indices = @transform_2, window_bounds = array<i64: 1, 1, 1>}]} {
    %c0_i32 = arith.constant 0 : i32
    %0 = arith.cmpi eq, %arg1, %c0_i32 : i32
    %1 = arith.extui %0 : i1 to i32
    %c0_i32_0 = arith.constant 0 : i32
    %2 = arith.cmpi ne, %1, %c0_i32_0 : i32
    scf.if %2 {
      %cst_16 = arith.constant 0.000000e+00 : f32
      %46 = vector.broadcast %cst_16 : f32 to vector<1x1xf32>
      %c0_17 = arith.constant 0 : index
      %c0_18 = arith.constant 0 : index
      %47 = vector.load %arg6[%c0_17, %c0_18] : memref<1x1xf32, #tpu.memory_space<vmem>>, vector<1x1xf32>
      tpu.vector_store %arg6[%c0_17, %c0_18], %46 {strides = array<i32>} : memref<1x1xf32, #tpu.memory_space<vmem>>, vector<1x1xf32>,
    } else {
    }
    %c0 = arith.constant 0 : index
    %c0_1 = arith.constant 0 : index
    %3 = vector.load %arg3[%c0, %c0_1] : memref<64x16xf32, #tpu.memory_space<vmem>>, vector<64x16xf32>
    %c0_2 = arith.constant 0 : index
    %c0_3 = arith.constant 0 : index
    %4 = vector.load %arg4[%c0_2, %c0_3] : memref<64x1xi32, #tpu.memory_space<vmem>>, vector<64x1xi32>
    %5 = tpu.iota {dimensions = array<i32: 1>} : vector<1x16xi32>
    %6 = vector.broadcast %5 : vector<1x16xi32> to vector<64x16xi32>
    %7 = vector.broadcast %4 : vector<64x1xi32> to vector<64x16xi32>
    %8 = arith.cmpi eq, %6, %7 : vector<64x16xi32>
    %cst = arith.constant dense<0xFF800000> : vector<64xf32>
    %9 = vector.multi_reduction <maximumf>, %3, %cst [1] : vector<64x16xf32> to vector<64xf32>
    %10 = vector.shape_cast %9 : vector<64xf32> to vector<64x1xf32>
    %11 = vector.broadcast %10 : vector<64x1xf32> to vector<64x16xf32>
    %12 = arith.subf %3, %11 : vector<64x16xf32>
    %cst_4 = arith.constant 0.000000e+00 : f32
    %13 = vector.broadcast %cst_4 : f32 to vector<64x16xf32>
    %14 = arith.select %8, %12, %13 : vector<64x16xi1>, vector<64x16xf32>
    %cst_5 = arith.constant dense<0.000000e+00> : vector<64xf32>
    %15 = vector.multi_reduction <add>, %14, %cst_5 [1] : vector<64x16xf32> to vector<64xf32>
    %16 = vector.shape_cast %15 : vector<64xf32> to vector<64x1xf32>
    %17 = math.exp %12 : vector<64x16xf32>
    %cst_6 = arith.constant dense<0.000000e+00> : vector<64xf32>
    %18 = vector.multi_reduction <add>, %17, %cst_6 [1] : vector<64x16xf32> to vector<64xf32>
    %19 = vector.shape_cast %18 : vector<64xf32> to vector<64x1xf32>
    %20 = math.log %19 : vector<64x1xf32>
    %21 = arith.subf %16, %20 : vector<64x1xf32>
    %22 = math.exp %21 : vector<64x1xf32>
    %cst_7 = arith.constant 1.000000e+00 : f32
    %23 = vector.broadcast %cst_7 : f32 to vector<64x1xf32>
    %24 = arith.subf %23, %22 : vector<64x1xf32>
    %25 = arith.mulf %24, %24 : vector<64x1xf32>
    %26 = arith.mulf %25, %21 : vector<64x1xf32>
    %c0_8 = arith.constant 0 : index
    %27 = memref.load %arg2[%c0_8] : memref<1xi32, #tpu.memory_space<smem>>
    %c5_i32 = arith.constant 5 : i32
    %28 = arith.muli %arg0, %c5_i32 : i32
    %29 = arith.addi %28, %arg1 : i32
    %c64_i32 = arith.constant 64 : i32
    %30 = arith.muli %29, %c64_i32 : i32
    %31 = tpu.iota {dimensions = array<i32: 0>} : vector<64x1xi32>
    %32 = vector.broadcast %30 : i32 to vector<64x1xi32>
    %33 = arith.addi %32, %31 : vector<64x1xi32>
    %34 = vector.broadcast %27 : i32 to vector<64x1xi32>
    %35 = arith.cmpi slt, %33, %34 : vector<64x1xi32>
    %cst_9 = arith.constant 0.000000e+00 : f32
    %36 = vector.broadcast %cst_9 : f32 to vector<64x1xf32>
    %37 = arith.select %35, %26, %36 : vector<64x1xi1>, vector<64x1xf32>
    %c0_10 = arith.constant 0 : index
    %c0_11 = arith.constant 0 : index
    %38 = vector.load %arg6[%c0_10, %c0_11] : memref<1x1xf32, #tpu.memory_space<vmem>>, vector<1x1xf32>
    %cst_12 = arith.constant dense<0.000000e+00> : vector<1xf32>
    %39 = vector.multi_reduction <add>, %37, %cst_12 [0] : vector<64x1xf32> to vector<1xf32>
    %40 = vector.shape_cast %39 : vector<1xf32> to vector<1x1xf32>
    %41 = arith.addf %38, %40 : vector<1x1xf32>
    %c0_13 = arith.constant 0 : index
    %c0_14 = arith.constant 0 : index
    %42 = vector.load %arg6[%c0_13, %c0_14] : memref<1x1xf32, #tpu.memory_space<vmem>>, vector<1x1xf32>
    tpu.vector_store %arg6[%c0_13, %c0_14], %41 {strides = array<i32>} : memref<1x1xf32, #tpu.memory_space<vmem>>, vector<1x1xf32>,
    %c4_i32 = arith.constant 4 : i32
    %43 = arith.cmpi eq, %arg1, %c4_i32 : i32
    %44 = arith.extui %43 : i1 to i32
    %c0_i32_15 = arith.constant 0 : i32
    %45 = arith.cmpi ne, %44, %c0_i32_15 : i32
    scf.if %45 {
      %c0_16 = arith.constant 0 : index
      %c0_17 = arith.constant 0 : index
      %46 = vector.load %arg6[%c0_16, %c0_17] : memref<1x1xf32, #tpu.memory_space<vmem>>, vector<1x1xf32>
      %c0_18 = arith.constant 0 : index
      %c0_19 = arith.constant 0 : index
      %c0_20 = arith.constant 0 : index
      %47 = vector.load %arg5[%c0_18, %c0_19, %c0_20] : memref<1x1x1xf32, #tpu.memory_space<vmem>>, vector<1x1x1xf32>
      %48 = vector.shape_cast %47 : vector<1x1x1xf32> to vector<1x1xf32>
      %49 = vector.shape_cast %46 : vector<1x1xf32> to vector<1x1x1xf32>
      tpu.vector_store %arg5[%c0_18, %c0_19, %c0_20], %49 {strides = array<i32>} : memref<1x1x1xf32, #tpu.memory_space<vmem>>, vector<1x1x1xf32>,
    } else {
    }
    return
  }
  func.func @transform_0(%arg0: i32, %arg1: i32, %arg2: memref<1xi32, #tpu.memory_space<smem>>) -> (i32, i32) {
    %c5_i32 = arith.constant 5 : i32
    %0 = arith.muli %arg0, %c5_i32 : i32
    %1 = arith.addi %0, %arg1 : i32
    %c4_i32 = arith.constant 4 : i32
    %2 = arith.minsi %1, %c4_i32 : i32
    %c0_i32 = arith.constant 0 : i32
    %c0_i32_0 = arith.constant 0 : i32
    return %2, %c0_i32 : i32, i32
  }
  func.func @transform_1(%arg0: i32, %arg1: i32, %arg2: memref<1xi32, #tpu.memory_space<smem>>) -> (i32, i32) {
    %c5_i32 = arith.constant 5 : i32
    %0 = arith.muli %arg0, %c5_i32 : i32
    %1 = arith.addi %0, %arg1 : i32
    %c4_i32 = arith.constant 4 : i32
    %2 = arith.minsi %1, %c4_i32 : i32
    %c0_i32 = arith.constant 0 : i32
    %c0_i32_0 = arith.constant 0 : i32
    return %2, %c0_i32 : i32, i32
  }
  func.func @transform_2(%arg0: i32, %arg1: i32, %arg2: memref<1xi32, #tpu.memory_space<smem>>) -> (i32, i32, i32) {
    %c0_i32 = arith.constant 0 : i32
    %c0_i32_0 = arith.constant 0 : i32
    %c0_i32_1 = arith.constant 0 : i32
    return %arg0, %c0_i32, %c0_i32_0 : i32, i32, i32
  }
}

</mosaic_0001>

<bundles_post_ra>
// kernel: tpu_custom_call.1
= control target key start
LH: loop header
LB: loop body
LE: loop exit
PB: predicated region body
PF: predicated region fallthrough
CT: control target
= control target key end

     0   :  { %s963_s0 = inlined_call_operand.<no memory space> [shape: s32[1], index: 0, kind: input, shape index: {}]   ;;  %s964_s1 = inlined_call_operand.vmem [shape: f32[300,16], index: 1, kind: input, shape index: {}]   ;;  %s965_s2 = inlined_call_operand.vmem [shape: s32[300,1], index: 2, kind: input, shape index: {}]   ;;  %s966_s3 = inlined_call_operand.hbm [shape: f32[1,1,1], index: 3, kind: output, shape index: {}]  }
   0x1   :  { %8 = sst [smem:[#allocation4]] %s963_s0 }
   0x2   :  { %9 = vsyncpa [#allocation6], 0  ;;  %s803_s14 = smov 0   ;;  %s805_s15 = smov 0  }
   0x3   :  { %s807_s16 = smov 0  }
   0x4 LB: > { %s627_s0 = sadd.s32 4294967295, %s775_s16   ;;  %s24_s17 = sadd.s32 1, %s771_s15  ;;  %s775_s16 = sphi %s807_s16, %s15_s16   ;;  %s771_s15 = sphi %s805_s15, %s969_s15   ;;  %s767_s14 = sphi %s803_s14, %s968_s14  }
   0x5   : > { %p25_p0 = scmp.ge.s32.totalorder %s24_s17, 5  ;;  %p630_p1 = scmp.ge.s32.totalorder %s775_s16, 1 }
   0x6   : > { %p187_p2 = scmp.lt.s32.totalorder %s775_s16, 6 }
   0x7   : > { %s971_s17 = smov (%p25_p0, %s24_s17), 0 }
   0x8   : > { %p188_p3 = pnand %p630_p1, %p187_p2 }
   0x9   : > { %p227_p4 = scmp.lt.s32.totalorder (!%p188_p3), %s767_s14, 4  ;;  %p635_p6 = scmp.ne.s32.totalorder (!%p188_p3), %s767_s14, 0 }
   0xa   : > { %191 = sbr.rel (%p188_p3) target bundleno = 422 (0x1a6), region = 28 }
   0xf   : > { %s228_s18 = scalar_select %p227_p4, %s767_s14, 4 }
  0x11   : > { %s631_s19 = sshll.u32 %s228_s18, 3 }
  0x12   : > { %p234_p5 = scmp.lt.s32.totalorder %s631_s19, 37  ;;  %272 = sbr.rel (%p635_p6) target bundleno = 25 (0x19), region = 32 }
  0x14   : > { %s973_s19 = smov (!%p234_p5, %s631_s19), 37 }
  0x15   : > { %s632_s20 = sshll.u32 %s973_s19, 3 }
  0x16   : > { %s237_s23 = scalar_lea.vmem %s964_s1, %s632_s20  ;;  %s832_s26 = scalar_lea.vmem %s965_s2, %s632_s20 }
  0x17   : > { %vm273_vm0 = vcmask 0   ;;  %v777_v0 = vmov 0.0  }
  0x18   : > { %274 = vst.msk [vmem:[#allocation2] sm:$0x1] %vm273_vm0, %v777_v0 }
  0x19 PF: > { %v277_v1 = vld [vmem:[%s237_s23 + $0x10] sm:$0xff]  ;;  %vm325_vm1 = vcmask 130048   ;;  %v275_v2 = vld [vmem:[%s237_s23] sm:$0xff]  ;;  %v278_v3 = vld [vmem:[%s237_s23 + $0x18] sm:$0xff]  ;;  %v778_v7 = vmov 0   ;;  %v291_v55 = vlaneseq  ;;  %s494_s27 = sld [smem:[#allocation4]] }
  0x1a   : > { %v332_v4 = vsel %vm325_vm1, %v277_v1, -inf  ;;  %v326_v5 = vsel %vm325_vm1, %v275_v2, -inf  ;;  %v276_v6 = vld [vmem:[%s237_s23 + $0x8] sm:$0xff]  ;;  %676 = vset.pattern.permute.xlu1 %v778_v7  ;;  %675 = vset.pattern.permute.xlu0 %v778_v7  ;;  %v335_v8 = vsel %vm325_vm1, %v278_v3, -inf  ;;  %v279_v11 = vld [vmem:[%s237_s23 + $0x20] sm:$0xff]  ;;  %v282_v14 = vld [vmem:[%s237_s23 + $0x38] sm:$0xff] }
  0x1b   : > { %333 = vmax.xlane.f32.xlu1 %v332_v4  ;;  %327 = vmax.xlane.f32.xlu0 %v326_v5  ;;  %v329_v9 = vsel %vm325_vm1, %v276_v6, -inf  ;;  %v280_v10 = vld [vmem:[%s237_s23 + $0x28] sm:$0xff]  ;;  %v338_v13 = vsel %vm325_vm1, %v279_v11, -inf  ;;  %v281_v15 = vld [vmem:[%s237_s23 + $0x30] sm:$0xff]  ;;  %v347_v16 = vsel %vm325_vm1, %v282_v14, -inf  ;;  %v283_v20 = vld [vmem:[%s832_s26] sm:$0xff] }
  0x1c   : > { %v341_v12 = vsel %vm325_vm1, %v280_v10, -inf  ;;  %v344_v17 = vsel %vm325_vm1, %v281_v15, -inf  ;;  %v284_v18 = vld [vmem:[%s832_s26 + $0x8] sm:$0xff]  ;;  %v285_v19 = vld [vmem:[%s832_s26 + $0x10] sm:$0xff]  ;;  %v286_v21 = vld [vmem:[%s832_s26 + $0x18] sm:$0xff]  ;;  %v292_v62 = vand.u32 127, %v291_v55 }
  0x1d   : > { %v287_v22 = vld [vmem:[%s832_s26 + $0x20] sm:$0xff]  ;;  %v288_v23 = vld [vmem:[%s832_s26 + $0x28] sm:$0xff]  ;;  %v289_v24 = vld [vmem:[%s832_s26 + $0x30] sm:$0xff]  ;;  %s636_s28 = sshll.u32 %s767_s14, 6  ;;  %p637_p7 = scmp.ne.s32.totalorder %s767_s14, 4 }
  0x1e   : > { %v290_v25 = vld [vmem:[%s832_s26 + $0x38] sm:$0xff] }
  0x1f   : > { %336 = vmax.xlane.f32.xlu1 %v335_v8  ;;  %330 = vmax.xlane.f32.xlu0 %v329_v9 }
  0x23   : > { %342 = vmax.xlane.f32.xlu1 %v341_v12  ;;  %339 = vmax.xlane.f32.xlu0 %v338_v13 }
  0x27   : > { %348 = vmax.xlane.f32.xlu1 %v347_v16  ;;  %345 = vmax.xlane.f32.xlu0 %v344_v17 }
  0x38   : > { %297 = vperm.xlu1 %676, %v284_v18  }
  0x3c   : > { %300 = vperm.xlu1 %676, %v285_v19  }
  0x3d   : > { %294 = vperm.xlu0 %675, %v283_v20  }
  0x40   : > { %303 = vperm.xlu1 %676, %v286_v21  }
  0x44   : > { %306 = vperm.xlu1 %676, %v287_v22  }
  0x48   : > { %309 = vperm.xlu1 %676, %v288_v23  }
  0x4c   : > { %312 = vperm.xlu1 %676, %v289_v24  }
  0x50   : > { %315 = vperm.xlu1 %676, %v290_v25  }
  0xa4   : > { %v334_v26 = vpop.xlane.xlu1 %333  ;;  %v328_v27 = vpop.xlane.xlu0 %327 }
  0xa5   : > { %v851_v28 = vsub.f32 %v275_v2, %v328_v27  ;;  %v854_v30 = vsub.f32 %v277_v1, %v334_v26 }
  0xa7   : > { %v390_v29 = vmul.f32 1.442695, %v851_v28  ;;  %v394_v37 = vmul.f32 1.442695, %v854_v30 }
  0xa8   : > { %v337_v31 = vpop.xlane.xlu1 %336  ;;  %v331_v32 = vpop.xlane.xlu0 %330 }
  0xa9   : > { %v856_v33 = vsub.f32 %v278_v3, %v337_v31  ;;  %v351_v34 = vsub.f32 %v276_v6, %v331_v32  ;;  %677 = vpow2.f32 %v390_v29 }
  0xab   : > { %v396_v35 = vmul.f32 1.442695, %v856_v33  ;;  %v392_v36 = vmul.f32 1.442695, %v351_v34 }
  0xac   : > { %v343_v38 = vpop.xlane.xlu1 %342  ;;  %v340_v39 = vpop.xlane.xlu0 %339 }
  0xad   : > { %679 = vpow2.f32 %v396_v35  ;;  %v860_v40 = vsub.f32 %v280_v10, %v343_v38  ;;  %v862_v41 = vsub.f32 %v279_v11, %v340_v39 }
  0xae   : > { %681 = vpow2.f32 %v392_v36 }
  0xaf   : > { %v400_v42 = vmul.f32 1.442695, %v860_v40  ;;  %v398_v43 = vmul.f32 1.442695, %v862_v41  ;;  %683 = vpow2.f32 %v394_v37 }
  0xb0   : > { %v349_v44 = vpop.xlane.xlu1 %348  ;;  %v346_v45 = vpop.xlane.xlu0 %345 }
  0xb1   : > { %685 = vpow2.f32 %v400_v42  ;;  %v866_v46 = vsub.f32 %v282_v14, %v349_v44  ;;  %v868_v47 = vsub.f32 %v281_v15, %v346_v45 }
  0xb2   : > { %687 = vpow2.f32 %v398_v43 }
  0xb3   : > { %v404_v48 = vmul.f32 1.442695, %v866_v46  ;;  %v402_v49 = vmul.f32 1.442695, %v868_v47 }
  0xb4   : > { %v298_v50 = vpop.permute.xlu1 %297 }
  0xb5   : > { %689 = vpow2.f32 %v404_v48  ;;  %vm318_vm2 = vcmp.eq.s32.totalorder %v292_v62, %v298_v50 }
  0xb6   : > { %691 = vpow2.f32 %v402_v49  ;;  %v678_v51 = vpop.eup %677  ;;  %v359_v9 = vsel %vm318_vm2, %v351_v34, 0.0  ;;  %vm548_vm2 = vcmask 0  }
  0xb7   : > { %v406_v53 = vsel %vm325_vm1, %v678_v51, 0.0  ;;  %v369_v12 = vsel %vm325_vm1, %v359_v9, 0.0 }
  0xb8   : > { %v301_v52 = vpop.permute.xlu1 %300  ;;  %407 = vadd.xlane.f32.xlu1 %v406_v53  ;;  %v295_v6 = vpop.permute.xlu0 %294 }
  0xb9   : > { %vm317_vm3 = vcmp.eq.s32.totalorder %v292_v62, %v295_v6  ;;  %vm319_vm5 = vcmp.eq.s32.totalorder %v292_v62, %v301_v52  ;;  %v499_v6 = vshrl.u32 %v291_v55, 7 }
  0xba   : > { %v680_v54 = vpop.eup %679  ;;  %v358_v14 = vsel %vm317_vm3, %v851_v28, 0.0  ;;  %v360_v19 = vsel %vm319_vm5, %v854_v30, 0.0 }
  0xbb   : > { %v682_v56 = vpop.eup %681  ;;  %v415_v57 = vsel %vm325_vm1, %v680_v54, 0.0  ;;  %v366_v17 = vsel %vm325_vm1, %v358_v14, 0.0  ;;  %v372_v21 = vsel %vm325_vm1, %v360_v19, 0.0  ;;  %v507_v14 = vstv %s636_s28 }
  0xbc   : > { %v304_v58 = vpop.permute.xlu1 %303  ;;  %v409_v59 = vsel %vm325_vm1, %v682_v56, 0.0  ;;  %v684_v60 = vpop.eup %683  ;;  %416 = vadd.xlane.f32.xlu1 %v415_v57 }
  0xbd   : > { %410 = vadd.xlane.f32.xlu0 %v409_v59  ;;  %v412_v2 = vsel %vm325_vm1, %v684_v60, 0.0  ;;  %vm320_vm4 = vcmp.eq.s32.totalorder %v292_v62, %v304_v58 }
  0xbe   : > { %v686_v61 = vpop.eup %685  ;;  %v361_v13 = vsel %vm320_vm4, %v856_v33, 0.0 }
  0xbf   : > { %v688_v63 = vpop.eup %687  ;;  %v421_v0 = vsel %vm325_vm1, %v686_v61, 0.0  ;;  %v375_v16 = vsel %vm325_vm1, %v361_v13, 0.0  ;;  %v500_v13 = vadd.s32 8, %v499_v6 }
  0xc0   : > { %v307_v1 = vpop.permute.xlu1 %306  ;;  %422 = vadd.xlane.f32.xlu1 %v421_v0  ;;  %v418_v4 = vsel %vm325_vm1, %v688_v63, 0.0 }
  0xc1   : > { %413 = vadd.xlane.f32.xlu0 %v412_v2  ;;  %vm321_vm7 = vcmp.eq.s32.totalorder %v292_v62, %v307_v1 }
  0xc2   : > { %v690_v3 = vpop.eup %689  ;;  %v362_v23 = vsel %vm321_vm7, %v862_v41, 0.0 }
  0xc3   : > { %v692_v5 = vpop.eup %691  ;;  %v427_v7 = vsel %vm325_vm1, %v690_v3, 0.0  ;;  %v378_v25 = vsel %vm325_vm1, %v362_v23, 0.0  ;;  %v508_v23 = vadd.s32 %v507_v14, %v499_v6 }
  0xc4   : > { %v310_v8 = vpop.permute.xlu1 %309  ;;  %428 = vadd.xlane.f32.xlu1 %v427_v7  ;;  %v424_v10 = vsel %vm325_vm1, %v692_v5, 0.0 }
  0xc5   : > { %419 = vadd.xlane.f32.xlu0 %v418_v4  ;;  %vm322_vm6 = vcmp.eq.s32.totalorder %v292_v62, %v310_v8 }
  0xc6   : > { %v363_v18 = vsel %vm322_vm6, %v860_v40, 0.0 }
  0xc7   : > { %v381_v20 = vsel %vm325_vm1, %v363_v18, 0.0  ;;  %v919_v18 = vstv %s494_s27 }
  0xc8   : > { %v313_v11 = vpop.permute.xlu1 %312  ;;  %370 = vadd.xlane.f32.xlu1 %v369_v12  ;;  %vm517_vm11 = vcmp.lt.s32.totalorder %v508_v23, %v919_v18 }
  0xc9   : > { %425 = vadd.xlane.f32.xlu0 %v424_v10  ;;  %vm323_vm9 = vcmp.eq.s32.totalorder %v292_v62, %v313_v11 }
  0xca   : > { %v364_v26 = vsel %vm323_vm9, %v868_v47, 0.0 }
  0xcb   : > { %v384_v27 = vsel %vm325_vm1, %v364_v26, 0.0 }
  0xcc   : > { %v316_v15 = vpop.permute.xlu1 %315  ;;  %376 = vadd.xlane.f32.xlu1 %v375_v16  ;;  %v509_v16 = vadd.s32 %v507_v14, %v500_v13 }
  0xcd   : > { %367 = vadd.xlane.f32.xlu0 %v366_v17  ;;  %vm324_vm8 = vcmp.eq.s32.totalorder %v292_v62, %v316_v15 }
  0xce   : > { %v365_v22 = vsel %vm324_vm8, %v866_v46, 0.0  ;;  %vm518_vm10 = vcmp.lt.s32.totalorder %v509_v16, %v919_v18 }
  0xcf   : > { %v387_v24 = vsel %vm325_vm1, %v365_v22, 0.0 }
  0xd0   : > { %382 = vadd.xlane.f32.xlu1 %v381_v20  ;;  %v501_v20 = vadd.s32 16, %v499_v6 }
  0xd1   : > { %373 = vadd.xlane.f32.xlu0 %v372_v21 }
  0xd4   : > { %388 = vadd.xlane.f32.xlu1 %v387_v24  ;;  %v502_v24 = vadd.s32 24, %v499_v6 }
  0xd5   : > { %379 = vadd.xlane.f32.xlu0 %v378_v25 }
  0xd9   : > { %385 = vadd.xlane.f32.xlu0 %v384_v27 }
 0x141   : > { %v408_v28 = vpop.xlane.xlu1 %407 }
 0x142   : > { %693 = vlog2.f32 %v408_v28 }
 0x145   : > { %v417_v29 = vpop.xlane.xlu1 %416 }
 0x146   : > { %v411_v30 = vpop.xlane.xlu0 %410  ;;  %695 = vlog2.f32 %v417_v29 }
 0x147   : > { %697 = vlog2.f32 %v411_v30 }
 0x149   : > { %v423_v31 = vpop.xlane.xlu1 %422 }
 0x14a   : > { %v414_v32 = vpop.xlane.xlu0 %413  ;;  %699 = vlog2.f32 %v423_v31  ;;  %v510_v31 = vadd.s32 %v507_v14, %v501_v20 }
 0x14b   : > { %701 = vlog2.f32 %v414_v32  ;;  %v503_v32 = vadd.s32 32, %v499_v6 }
 0x14c   : > { %vm519_vm12 = vcmp.lt.s32.totalorder %v510_v31, %v919_v18 }
 0x14d   : > { %v429_v33 = vpop.xlane.xlu1 %428 }
 0x14e   : > { %v420_v34 = vpop.xlane.xlu0 %419  ;;  %703 = vlog2.f32 %v429_v33 }
 0x14f   : > { %705 = vlog2.f32 %v420_v34  ;;  %v694_v35 = vpop.eup %693 }
 0x150   : > { %v431_v41 = vmul.f32 0.6931472, %v694_v35 }
 0x151   : > { %v371_v36 = vpop.xlane.xlu1 %370 }
 0x152   : > { %v426_v37 = vpop.xlane.xlu0 %425 }
 0x153   : > { %707 = vlog2.f32 %v426_v37  ;;  %v696_v38 = vpop.eup %695 }
 0x154   : > { %v698_v39 = vpop.eup %697  ;;  %v437_v40 = vmul.f32 0.6931472, %v696_v38  ;;  %v504_v38 = vadd.s32 40, %v499_v6 }
 0x155   : > { %v433_v42 = vmul.f32 0.6931472, %v698_v39  ;;  %v377_v43 = vpop.xlane.xlu1 %376 }
 0x156   : > { %v368_v44 = vpop.xlane.xlu0 %367  ;;  %v896_v45 = vsub.f32 %v377_v43, %v437_v40 }
 0x157   : > { %v898_v46 = vsub.f32 %v368_v44, %v431_v41  ;;  %v700_v47 = vpop.eup %699  ;;  %v447_v48 = vsub.f32 %v371_v36, %v433_v42  ;;  %v511_v36 = vadd.s32 %v507_v14, %v502_v24  ;;  %v505_v42 = vadd.s32 48, %v499_v6 }
 0x158   : > { %v702_v49 = vpop.eup %701  ;;  %v460_v50 = vmul.f32 1.442695, %v896_v45  ;;  %v441_v52 = vmul.f32 0.6931472, %v700_v47 }
 0x159   : > { %v454_v51 = vmul.f32 1.442695, %v898_v46  ;;  %v456_v53 = vmul.f32 1.442695, %v447_v48  ;;  %v383_v54 = vpop.xlane.xlu1 %382  ;;  %v435_v56 = vmul.f32 0.6931472, %v702_v49  ;;  %v512_v49 = vadd.s32 %v507_v14, %v503_v32 }
 0x15a   : > { %v374_v57 = vpop.xlane.xlu0 %373  ;;  %709 = vpow2.f32 %v460_v50  ;;  %v902_v58 = vsub.f32 %v383_v54, %v441_v52  ;;  %vm520_vm13 = vcmp.lt.s32.totalorder %v511_v36, %v919_v18  ;;  %v506_v54 = vadd.s32 56, %v499_v6 }
 0x15b   : > { %v704_v59 = vpop.eup %703  ;;  %711 = vpow2.f32 %v456_v53  ;;  %v904_v60 = vsub.f32 %v374_v57, %v435_v56  ;;  %v513_v53 = vadd.s32 %v507_v14, %v504_v38  ;;  %vm521_vm14 = vcmp.lt.s32.totalorder %v512_v49, %v919_v18 }
 0x15c   : > { %v706_v61 = vpop.eup %705  ;;  %713 = vpow2.f32 %v454_v51  ;;  %v464_v62 = vmul.f32 1.442695, %v902_v58  ;;  %v445_v63 = vmul.f32 0.6931472, %v704_v59 }
 0x15d   : > { %v458_v0 = vmul.f32 1.442695, %v904_v60  ;;  %v389_v1 = vpop.xlane.xlu1 %388  ;;  %v439_v2 = vmul.f32 0.6931472, %v706_v61  ;;  %v514_v61 = vadd.s32 %v507_v14, %v505_v42  ;;  %vm522_vm15 = vcmp.lt.s32.totalorder %v513_v53, %v919_v18 }
 0x15e   : > { %v380_v3 = vpop.xlane.xlu0 %379  ;;  %715 = vpow2.f32 %v464_v62  ;;  %v908_v4 = vsub.f32 %v389_v1, %v445_v63 }
 0x15f   : > { %717 = vpow2.f32 %v458_v0  ;;  %v911_v7 = vsub.f32 %v380_v3, %v439_v2  ;;  %v515_v2 = vadd.s32 %v507_v14, %v506_v54  ;;  %vm523_vm0 = vcmp.lt.s32.totalorder %v514_v61, %v919_v18 }
 0x160   : > { %v708_v5 = vpop.eup %707  ;;  %v468_v8 = vmul.f32 1.442695, %v908_v4 }
 0x161   : > { %v443_v9 = vmul.f32 0.6931472, %v708_v5  ;;  %v462_v10 = vmul.f32 1.442695, %v911_v7  ;;  %vm524_vm1 = vcmp.lt.s32.totalorder %v515_v2, %v919_v18 }
 0x162   : > { %v386_v11 = vpop.xlane.xlu0 %385  ;;  %719 = vpow2.f32 %v468_v8 }
 0x163   : > { %v916_v12 = vsub.f32 %v386_v11, %v443_v9  ;;  %721 = vpow2.f32 %v462_v10 }
 0x165   : > { %v466_v15 = vmul.f32 1.442695, %v916_v12 }
 0x167   : > { %723 = vpow2.f32 %v466_v15  ;;  %v710_v55 = vpop.eup %709 }
 0x168   : > { %v712_v17 = vpop.eup %711  ;;  %v473_v19 = vsub.f32 1.0, %v710_v55 }
 0x169   : > { %v714_v21 = vpop.eup %713  ;;  %v471_v22 = vsub.f32 1.0, %v712_v17 }
 0x16a   : > { %v470_v25 = vsub.f32 1.0, %v714_v21  ;;  %v481_v29 = vmul.f32 %v473_v19, %v473_v19  ;;  %v533_v21 = vld [vmem:[#allocation2] sm:$0x1] }
 0x16b   : > { %v716_v26 = vpop.eup %715  ;;  %v479_v27 = vmul.f32 %v471_v22, %v471_v22 }
 0x16c   : > { %v718_v28 = vpop.eup %717  ;;  %v478_v30 = vmul.f32 %v470_v25, %v470_v25  ;;  %v475_v34 = vsub.f32 1.0, %v716_v26  ;;  %v489_v44 = vmul.f32 %v481_v29, %v896_v45 }
 0x16d   : > { %v487_v33 = vmul.f32 %v479_v27, %v447_v48  ;;  %v472_v35 = vsub.f32 1.0, %v718_v28 }
 0x16e   : > { %v486_v37 = vmul.f32 %v478_v30, %v898_v46  ;;  %v483_v48 = vmul.f32 %v475_v34, %v475_v34  ;;  %v528_v63 = vsel %vm520_vm13, %v489_v44, 0.0 }
 0x16f   : > { %v720_v39 = vpop.eup %719  ;;  %v526_v40 = vsel %vm518_vm10, %v487_v33, 0.0  ;;  %v480_v41 = vmul.f32 %v472_v35, %v472_v35 }
 0x170   : > { %v722_v43 = vpop.eup %721  ;;  %v525_v47 = vsel %vm517_vm11, %v486_v37, 0.0  ;;  %v477_v51 = vsub.f32 1.0, %v720_v39  ;;  %v491_v0 = vmul.f32 %v483_v48, %v902_v58 }
 0x171   : > { %v488_v50 = vmul.f32 %v480_v41, %v904_v60  ;;  %v474_v52 = vsub.f32 1.0, %v722_v43  ;;  %v534_v46 = vadd.f32 %v526_v40, %v525_v47 }
 0x172   : > { %v485_v1 = vmul.f32 %v477_v51, %v477_v51  ;;  %v530_v10 = vsel %vm522_vm15, %v491_v0, 0.0 }
 0x173   : > { %v527_v57 = vsel %vm519_vm12, %v488_v50, 0.0  ;;  %v482_v59 = vmul.f32 %v474_v52, %v474_v52 }
 0x174   : > { %v724_v56 = vpop.eup %723  ;;  %v535_v62 = vadd.f32 %v534_v46, %v527_v57  ;;  %v493_v11 = vmul.f32 %v485_v1, %v908_v4 }
 0x175   : > { %v476_v45 = vsub.f32 1.0, %v724_v56  ;;  %v490_v60 = vmul.f32 %v482_v59, %v911_v7 }
 0x176   : > { %v536_v3 = vadd.f32 %v535_v62, %v528_v63  ;;  %v532_v7 = vsel %vm524_vm1, %v493_v11, 0.0 }
 0x177   : > { %v484_v5 = vmul.f32 %v476_v45, %v476_v45  ;;  %v529_v6 = vsel %vm521_vm14, %v490_v60, 0.0 }
 0x178   : > { %v537_v8 = vadd.f32 %v536_v3, %v529_v6 }
 0x179   : > { %v492_v9 = vmul.f32 %v484_v5, %v916_v12 }
 0x17a   : > { %v538_v58 = vadd.f32 %v537_v8, %v530_v10 }
 0x17b   : > { %v531_v13 = vsel %vm523_vm0, %v492_v9, 0.0 }
 0x17c   : > { %v539_v15 = vadd.f32 %v538_v58, %v531_v13 }
 0x17e   : > { %v540_v55 = vadd.f32 %v539_v15, %v532_v7 }
 0x180   : > { %v541_v16 = vrot.slane %v540_v55, 4 }
 0x182   : > { %v542_v14 = vadd.f32 %v541_v16, %v540_v55 }
 0x184   : > { %v543_v17 = vrot.slane %v542_v14, 2 }
 0x186   : > { %v544_v19 = vadd.f32 %v543_v17, %v542_v14 }
 0x188   : > { %v545_v20 = vrot.slane %v544_v19, 1 }
 0x18a   : > { %v546_v22 = vadd.f32 %v545_v20, %v544_v19  ;;  %553 = sbr.rel (%p637_p7) target bundleno = 407 (0x197), region = 36 }
 0x18c   : > { %v547_v23 = vadd.f32 %v546_v22, %v533_v21 }
 0x18e   : > { %549 = vst.msk [vmem:[#allocation2] sm:$0x1] %vm548_vm2, %v547_v23 }
 0x195   : > { %v554_v4 = vld [vmem:[#allocation2] sm:$0x1] }
 0x196   : > { %555 = vst.msk [vmem:[#allocation5] sm:$0x1] %vm548_vm2, %v554_v4 }
 0x197 PF: > { %p939_p8 = scmp.eq.s32.totalorder %s627_s0, 4  ;;  %s779_s30 = smov [#allocation5]  }
 0x198   : > { %s565_s4 = sshll.u32 %s779_s30, 4  ;;  %s566_s4 = int_to_ptr.vmem [resolvable:$true] %s565_s4 }
 0x199   : > { %s725_s5 = scalar_lea.vmem %s566_s4, 16  ;;  %s731_s6 = scalar_lea.vmem %s566_s4, 32 }
 0x19a   : > { %p726_p9 = scmp.ne.s32.totalorder %s566_s4, %s725_s5  ;;  %p732_p12 = scmp.lt.s32.totalorder %s566_s4, %s566_s4 }
 0x19b   : > { %p733_p13 = scmp.lt.s32.totalorder %s731_s6, %s725_s5 }
 0x19c   : > { %p727_p10 = pnand %p726_p9, %p939_p8 }
 0x19d   : > { %p734_p0 = por %p733_p13, %p732_p12 }
 0x19e   : > { %p728_p11 = pneg %p727_p10 }
 0x1a0   : > { %p735_p1 = pnand %p734_p0, %p728_p11 }
 0x1a2   : > { %738 = shalt.err (!%p735_p1)
}
 0x1a3   : > { %643 = dma.vmem_to_hbm [thread:$0]  (%p939_p8), %s566_s4, 16, %s966_s3, [#allocation6]  }
 0x1a4   : > { %762 = dma.done.wait (%p939_p8), [#allocation6], 16  }
 0x1a5   : > { %764 = vsyncadd (%p939_p8), [#allocation6], 4294967280 }
 0x1a6 PF: > { %s15_s16 = sadd.s32 1, %s775_s16   ;;  %s968_s14 = smov %s771_s15 }
 0x1a7   : > { %p12_p2 = scmp.ge.s32.totalorder %s15_s16, 7   ;;  %s969_s15 = smov %s971_s17 }
 0x1a9   :  { %14 = sbr.rel (!%p12_p2) target bundleno = 4 (0x4), region = 67 }
 0x1ae   :  { %578 = vsyncpa [#allocation6], 1 }
 0x1af   :  { %580 = vsyncpa [#allocation6 + $0x1], 1 }

</bundles_post_ra>
